<compile_context>
chip_gen: v7x
topology: tpu7x:2x2x1
jax: 0.10.0
libtpu: 0.0.40
codegen_flags: <defaults>
</compile_context>

<pallas_src>
import functools

import jax
import jax.numpy as jnp
from jax.experimental import pallas as pl
from jax.experimental.pallas import tpu as pltpu


_MASK_VALUE = float(jnp.finfo(jnp.float32).min)  # finite "-inf"; exp underflows to 0


def _scaled_attention_kernel(*refs, use_mask, batched, scale, emit_attn,
                             cast_bf16):
    it = iter(refs)
    q_ref = next(it)
    k_ref = next(it)
    v_ref = next(it)
    m_ref = next(it) if use_mask else None
    out_ref = next(it)
    attn_ref = next(it) if emit_attn else None

    q = q_ref[...]
    k = k_ref[...]
    v = v_ref[...]
    if cast_bf16 and q.dtype == jnp.float32:
        # v5e accuracy/perf flag: bf16 MXU operands, f32 accumulation below.
        q = q.astype(jnp.bfloat16)
        k = k.astype(jnp.bfloat16)
        v = v.astype(jnp.bfloat16)
    # Fold 1/sqrt(d_model) into q: tq*Dk multiplies instead of tq*Lk.
    q = q * scale

    eq_qk = "bqd,bkd->bqk" if batched else "qd,kd->qk"
    eq_av = "bqk,bkd->bqd" if batched else "qk,kd->qd"

    # scores = (q / temper) @ k^T with f32 accumulation on the MXU
    # TODO(synk): if the Mosaic dump shows a per-step vxpose of the K tile for
    # this contraction, pre-transpose K once in the wrapper ((B, Dk, Lk)).
    s = jnp.einsum(eq_qk, q, k, preferred_element_type=jnp.float32)
    if use_mask:
        m = m_ref[...]
        masked = m if m.dtype == jnp.bool_ else (m != 0)
        s = jnp.where(masked, _MASK_VALUE, s)   # broadcasts (.,1,Lk) key masks

    # Numerically stable softmax over the key axis.
    mx = jnp.max(s, axis=-1, keepdims=True)
    p = jnp.exp(s - mx)
    denom = jnp.sum(p, axis=-1, keepdims=True)
    # approx=True -> EUP vrcp in its own bundle slot; rows sum to 1 within ~1e-4.
    recip = pl.reciprocal(denom, approx=True)

    # Normalize AFTER the PV matmul: the MXU op depends only on exp/sum, and the
    # rescale costs tq*Dv multiplies (Dv ~ 32) instead of tq*Lk on its input.
    # TODO(synk): nn.Dropout(p=0.1) is identity in eval mode; training-mode
    # dropout would use pltpu.prng_seed + pltpu.stateful_bernoulli on p here.
    pv = jnp.einsum(eq_av, p.astype(v.dtype), v,
                    preferred_element_type=jnp.float32)
    out_ref[...] = (pv * recip).astype(out_ref.dtype)
    if emit_attn:
        attn_ref[...] = (p * recip).astype(attn_ref.dtype)


def _pick_q_block(lq, target):
    """Largest q-tile <= target dividing Lq, multiple of 32 (layout-friendly for
    f32/bf16/int8 sublane tiles); otherwise the full Lq (always legal)."""
    if lq <= target:
        return lq
    t = target - (target % 32)
    while t >= 32:
        if lq % t == 0:
            return t
        t -= 32
    return lq


def _device_profile():
    """Best-effort chip introspection: (physical VMEM bytes, multi-TensorCore)."""
    kind = ""
    try:
        kind = jax.devices()[0].device_kind.lower()
    except Exception:
        pass
    phys_vmem = None
    try:
        phys_vmem = int(getattr(pltpu.get_tpu_info(),
                                "vmem_capacity_bytes", 0)) or None
    except Exception:
        phys_vmem = None
    if phys_vmem is None:
        # Conservative fallback: assume the smaller (v7x-class) VMEM if unknown.
        phys_vmem = (128 << 20) if ("v5" in kind or "v6" in kind) else (64 << 20)
    is_v5e = ("v5e" in kind) or ("v5 lite" in kind) or ("v5lite" in kind)
    # Chips whose TensorCores split grid "parallel" axes (megacore-style).
    multi_tc = ("v4" in kind) or ("7" in kind) or ("v5" in kind and not is_v5e)
    return phys_vmem, multi_tc


def scaled_attention(q, k, v, d_model, attn_mask=None, *, q_block=None,
                     batch_block=None, return_attn=True, attn_dtype=None,
                     allow_bf16_matmul=False):
    """Pallas implementation of ScaledAttention.forward (eval mode).

    attn_mask may be the full (B, Lq, Lk) mask (PyTorch semantics) or a
    broadcastable key-padding mask of shape (B, Lk) / (B, 1, Lk). bool / int8 /
    uint8 masks are passed through without a copy.  Set return_attn=False when
    the attention weights are not needed (drops the largest HBM writeback),
    attn_dtype=jnp.bfloat16 to halve it, and allow_bf16_matmul=True on v5e for
    f32 inputs (bf16 MXU feeds, f32 accumulation; ~1e-2 level deviation).
    """
    B, Lq, Dk = q.shape
    Bk, Lk, Dk2 = k.shape
    Bv, Lv, Dv = v.shape
    assert B == Bk == Bv and Dk == Dk2 and Lk == Lv

    # ---- mask handling (no copy for 1-byte masks; key masks broadcast) ------
    use_mask = attn_mask is not None
    key_mask_flag = False
    mask = None
    if use_mask:
        mask = attn_mask
        if mask.ndim == 2:
            assert mask.shape == (B, Lk), (mask.shape, (B, Lk))
            mask = mask.reshape(B, 1, Lk)          # free (metadata) reshape
        assert mask.shape in ((B, 1, Lk), (B, Lq, Lk)), mask.shape
        key_mask_flag = (mask.shape[1] == 1) and (Lq != 1)
        if jnp.dtype(mask.dtype).itemsize != 1:    # bool/int8/uint8 pass through
            mask = (mask != 0).astype(jnp.int8)

    scale = 1.0 / (float(d_model) ** 0.5)
    attn_dtype = jnp.dtype(q.dtype if attn_dtype is None else attn_dtype)

    in_item = jnp.dtype(q.dtype).itemsize
    out_item = in_item
    attn_item = attn_dtype.itemsize if return_attn else 0

    # ---- chip-aware block selection -----------------------------------------
    phys_vmem, multi_tc = _device_profile()
    vmem_cap = (40 << 20) if phys_vmem <= (64 << 20) else (64 << 20)

    def step_vmem(bb_, tq_):
        """Estimated VMEM for one grid step (double-buffered windows + temps)."""
        mrows = 0 if not use_mask else (1 if key_mask_flag else tq_)
        ins = bb_ * ((tq_ * Dk + Lk * Dk + Lk * Dv) * in_item + mrows * Lk)
        outs = bb_ * tq_ * Dv * out_item
        if return_attn:
            outs += bb_ * tq_ * Lk * attn_item
        # f32 intermediates: ~2 live (tq, Lk) score blocks + row statistics.
        interm = bb_ * tq_ * (2 * Lk + 4) * 4
        return 2 * (ins + outs) + interm

    if q_block is not None:
        tq = int(q_block)
    else:
        target = 512
        if phys_vmem <= (64 << 20) and Lk >= 2048:
            target = 256                 # v7x-class: only 64 MiB physical VMEM
        tq = _pick_q_block(Lq, target)
        while step_vmem(1, tq) > vmem_cap - (4 << 20) and tq > 32:
            new_tq = _pick_q_block(Lq, max(32, tq // 2))
            if new_tq >= tq:
                break
            tq = new_tq
    assert Lq % tq == 0, (Lq, tq)

    # Fat-step window target: amortize the ~0.35 us/step overhead.
    step_target = min((12 << 20) if phys_vmem <= (64 << 20) else (24 << 20),
                      vmem_cap - (8 << 20))
    if batch_block is not None:
        bb = int(batch_block)
    elif tq != Lq:
        bb = 1                            # q already tiled; one batch per step
    else:
        max_bb = B
        if multi_tc and B >= 2:
            max_bb = max(1, B // 2)       # keep >=2 parallel steps for 2 TCs
        bb = 1
        for d in range(B, 0, -1):
            if B % d == 0 and d <= max_bb and step_vmem(d, tq) <= step_target:
                bb = d
                break
    assert B % bb == 0, (B, bb)

    needed = step_vmem(bb, tq) + (2 << 20)
    vmem_limit = int(min(max(needed, 32 << 20), vmem_cap))

    # bb > 1: fuse several batch elements per step (fat steps for tiny shapes).
    # bb == 1: squeeze the batch dim so the kernel runs clean 2-D MXU dots.
    batched = bb > 1

    def blk(rows, cols):
        return (bb, rows, cols) if batched else (None, rows, cols)

    grid = (B // bb, Lq // tq)

    # TODO(synk): for very long Lk add an innermost "arbitrary" Lk grid axis with
    # online (flash-style) softmax — most valuable on v7x / return_attn=False;
    # full K/V per step is fine for benepar-scale shapes.
    # TODO(synk): lane-dense output restructuring (pad Lk to a multiple of 128 or
    # flatten minor dims) when Lk % 128 != 0 and the attn writeback dominates.
    in_specs = [
        pl.BlockSpec(blk(tq, Dk), lambda b, i: (b, i, 0)),   # q tile
        pl.BlockSpec(blk(Lk, Dk), lambda b, i: (b, 0, 0)),   # full K (reused)
        pl.BlockSpec(blk(Lk, Dv), lambda b, i: (b, 0, 0)),   # full V (reused)
    ]
    args = [q, k, v]
    if use_mask:
        if key_mask_flag:
            in_specs.append(pl.BlockSpec(blk(1, Lk), lambda b, i: (b, 0, 0)))
        else:
            in_specs.append(pl.BlockSpec(blk(tq, Lk), lambda b, i: (b, i, 0)))
        args.append(mask)

    out_spec_o = pl.BlockSpec(blk(tq, Dv), lambda b, i: (b, i, 0))
    out_shape_o = jax.ShapeDtypeStruct((B, Lq, Dv), q.dtype)
    if return_attn:
        out_specs = [out_spec_o,
                     pl.BlockSpec(blk(tq, Lk), lambda b, i: (b, i, 0))]
        out_shape = (out_shape_o,
                     jax.ShapeDtypeStruct((B, Lq, Lk), attn_dtype))
    else:
        out_specs = out_spec_o
        out_shape = out_shape_o

    kernel = functools.partial(
        _scaled_attention_kernel, use_mask=use_mask, batched=batched,
        scale=scale, emit_attn=return_attn, cast_bf16=allow_bf16_matmul)

    return pl.pallas_call(
        kernel,
        out_shape=out_shape,
        grid_spec=pltpu.PrefetchScalarGridSpec(
            num_scalar_prefetch=0,
            grid=grid,
            in_specs=in_specs,
            out_specs=out_specs,
        ),
        compiler_params=pltpu.CompilerParams(
            dimension_semantics=("parallel", "parallel"),
            vmem_limit_bytes=vmem_limit),
    )(*args)


def _reference(q, k, v, d_model, attn_mask=None):
    temper = float(d_model) ** 0.5
    s = jnp.einsum('bqd,bkd->bqk', q, k) / temper
    if attn_mask is not None:
        s = jnp.where(attn_mask, -jnp.inf, s)
    attn = jax.nn.softmax(s, axis=-1)
    out = jnp.einsum('bqk,bkd->bqd', attn, v)
    return out, attn


if __name__ == "__main__":
    # Small shapes consistent with the module: hparams.d_model = 32.
    B, Lq, Lk, D_MODEL = 2, 8, 8, 32
    Dk = Dv = D_MODEL

    key = jax.random.PRNGKey(0)
    kq, kk, kv = jax.random.split(key, 3)
    q = jax.random.normal(kq, (B, Lq, Dk), jnp.float32)
    k = jax.random.normal(kk, (B, Lk, Dk), jnp.float32)
    v = jax.random.normal(kv, (B, Lk, Dv), jnp.float32)
    # Deterministic masks: mask out the last key position for every query.
    full_mask = jnp.zeros((B, Lq, Lk), jnp.bool_).at[:, :, -1].set(True)
    key_mask = jnp.zeros((B, Lk), jnp.bool_).at[:, -1].set(True)

    def close(x, y, tol=2e-3):
        # approx reciprocal makes rows sum to 1 only to ~1e-4; allow headroom.
        return bool(jnp.allclose(x, y, atol=tol, rtol=tol))

    ref_o, ref_a = _reference(q, k, v, D_MODEL)
    ref_om, ref_am = _reference(q, k, v, D_MODEL, attn_mask=full_mask)

    ok = True
    # Fat-batch step, no mask -> no mask DMA.
    o, a = jax.block_until_ready(scaled_attention(q, k, v, D_MODEL))
    ok &= close(o, ref_o) and close(a, ref_a)
    # Full bool mask passed through without a wrapper-side copy.
    o, a = jax.block_until_ready(
        scaled_attention(q, k, v, D_MODEL, attn_mask=full_mask))
    ok &= close(o, ref_om) and close(a, ref_am)
    # Broadcastable (B, Lk) key-padding mask (Lq x smaller mask stream).
    o, a = jax.block_until_ready(
        scaled_attention(q, k, v, D_MODEL, attn_mask=key_mask))
    ok &= close(o, ref_om) and close(a, ref_am)
    # Squeezed-batch path (clean 2-D MXU dots), with mask.
    o, a = jax.block_until_ready(
        scaled_attention(q, k, v, D_MODEL, attn_mask=full_mask, batch_block=1))
    ok &= close(o, ref_om) and close(a, ref_am)
    # Attention weights not requested -> single output stream.
    o = jax.block_until_ready(
        scaled_attention(q, k, v, D_MODEL, return_attn=False))
    ok &= close(o, ref_o)
    # bf16 attention-weight writeback (halved attn HBM stream).
    o, a = jax.block_until_ready(
        scaled_attention(q, k, v, D_MODEL, attn_dtype=jnp.bfloat16))
    ok &= close(o, ref_o) and close(a.astype(jnp.float32), ref_a, tol=8e-3)
    # bf16 MXU feeds for f32 inputs (v5e accuracy flag).
    o, a = jax.block_until_ready(
        scaled_attention(q, k, v, D_MODEL, allow_bf16_matmul=True))
    ok &= close(o, ref_o, tol=5e-2) and close(a, ref_a, tol=5e-2)

    assert bool(ok), "Pallas ScaledAttention mismatch vs reference"
    print("KERNEL_OK")
</pallas_src>

<mosaic_0001>
module attributes {stable_mosaic.version = 11 : i64} {
  func.func @_scaled_attention_kernel(%arg0: i32, %arg1: i32, %arg2: memref<2x8x32xf32, #tpu.memory_space<vmem>>, %arg3: memref<2x8x32xf32, #tpu.memory_space<vmem>>, %arg4: memref<2x8x32xf32, #tpu.memory_space<vmem>>, %arg5: memref<2x8x32xf32, #tpu.memory_space<vmem>>, %arg6: memref<2x8x8xf32, #tpu.memory_space<vmem>>) attributes {dimension_semantics = [#tpu.dimension_semantics<parallel>, #tpu.dimension_semantics<parallel>], iteration_bounds = array<i64: 1, 1>, scalar_prefetch = 0 : i64, scratch_operands = 0 : i64, tpu.core_type = #tpu.core_type<tc>, window_params = [{transform_indices = @transform_0, window_bounds = array<i64: 2, 8, 32>}, {transform_indices = @transform_1, window_bounds = array<i64: 2, 8, 32>}, {transform_indices = @transform_2, window_bounds = array<i64: 2, 8, 32>}, {transform_indices = @transform_3, window_bounds = array<i64: 2, 8, 32>}, {transform_indices = @transform_4, window_bounds = array<i64: 2, 8, 8>}]} {
    %c0 = arith.constant 0 : index
    %c0_0 = arith.constant 0 : index
    %c0_1 = arith.constant 0 : index
    %0 = vector.load %arg2[%c0, %c0_0, %c0_1] : memref<2x8x32xf32, #tpu.memory_space<vmem>>, vector<2x8x32xf32>
    %c0_2 = arith.constant 0 : index
    %c0_3 = arith.constant 0 : index
    %c0_4 = arith.constant 0 : index
    %1 = vector.load %arg3[%c0_2, %c0_3, %c0_4] : memref<2x8x32xf32, #tpu.memory_space<vmem>>, vector<2x8x32xf32>
    %c0_5 = arith.constant 0 : index
    %c0_6 = arith.constant 0 : index
    %c0_7 = arith.constant 0 : index
    %2 = vector.load %arg4[%c0_5, %c0_6, %c0_7] : memref<2x8x32xf32, #tpu.memory_space<vmem>>, vector<2x8x32xf32>
    %cst = arith.constant 0.176776692 : f32
    %3 = vector.broadcast %cst : f32 to vector<2x8x32xf32>
    %4 = arith.mulf %0, %3 : vector<2x8x32xf32>
    "tpu.trace_start"() <{level = 10 : i32, message = "bqd,bkd->bqk"}> : () -> ()
    %cst_8 = arith.constant dense<0.000000e+00> : vector<2x8x8xf32>
    %5 = tpu.matmul %4, %1, %cst_8 {dimension_numbers = #tpu.dot_dimension_numbers<[2], [2], [1], [1], [0, 0, 0, 1, 1, 1], [0], [0]>} : vector<2x8x32xf32>, vector<2x8x32xf32>, vector<2x8x8xf32> -> vector<2x8x8xf32>
    "tpu.trace_stop"() : () -> ()
    %cst_9 = arith.constant dense<0xFF800000> : vector<2x8xf32>
    %6 = vector.multi_reduction <maximumf>, %5, %cst_9 [2] : vector<2x8x8xf32> to vector<2x8xf32>
    %7 = vector.shape_cast %6 : vector<2x8xf32> to vector<2x8x1xf32>
    %8 = vector.broadcast %7 : vector<2x8x1xf32> to vector<2x8x8xf32>
    %9 = arith.subf %5, %8 : vector<2x8x8xf32>
    %10 = math.exp %9 : vector<2x8x8xf32>
    %cst_10 = arith.constant dense<0.000000e+00> : vector<2x8xf32>
    %11 = vector.multi_reduction <add>, %10, %cst_10 [2] : vector<2x8x8xf32> to vector<2x8xf32>
    %12 = vector.shape_cast %11 : vector<2x8xf32> to vector<2x8x1xf32>
    %13 = tpu.reciprocal %12 {approx = true} : vector<2x8x1xf32> -> vector<2x8x1xf32>
    "tpu.trace_start"() <{level = 10 : i32, message = "bqk,bkd->bqd"}> : () -> ()
    %cst_11 = arith.constant dense<0.000000e+00> : vector<2x8x32xf32>
    %14 = tpu.matmul %10, %2, %cst_11 {dimension_numbers = #tpu.dot_dimension_numbers<[2], [1], [1], [2], [0, 0, 0, 1, 1, 2], [0], [0]>} : vector<2x8x8xf32>, vector<2x8x32xf32>, vector<2x8x32xf32> -> vector<2x8x32xf32>
    "tpu.trace_stop"() : () -> ()
    %15 = vector.broadcast %13 : vector<2x8x1xf32> to vector<2x8x32xf32>
    %16 = arith.mulf %14, %15 : vector<2x8x32xf32>
    %c0_12 = arith.constant 0 : index
    %c0_13 = arith.constant 0 : index
    %c0_14 = arith.constant 0 : index
    %17 = vector.load %arg5[%c0_12, %c0_13, %c0_14] : memref<2x8x32xf32, #tpu.memory_space<vmem>>, vector<2x8x32xf32>
    tpu.vector_store %arg5[%c0_12, %c0_13, %c0_14], %16 {strides = array<i32>} : memref<2x8x32xf32, #tpu.memory_space<vmem>>, vector<2x8x32xf32>,
    %18 = vector.broadcast %13 : vector<2x8x1xf32> to vector<2x8x8xf32>
    %19 = arith.mulf %10, %18 : vector<2x8x8xf32>
    %c0_15 = arith.constant 0 : index
    %c0_16 = arith.constant 0 : index
    %c0_17 = arith.constant 0 : index
    %20 = vector.load %arg6[%c0_15, %c0_16, %c0_17] : memref<2x8x8xf32, #tpu.memory_space<vmem>>, vector<2x8x8xf32>
    tpu.vector_store %arg6[%c0_15, %c0_16, %c0_17], %19 {strides = array<i32>} : memref<2x8x8xf32, #tpu.memory_space<vmem>>, vector<2x8x8xf32>,
    return
  }
  func.func @transform_0(%arg0: i32, %arg1: i32) -> (i32, i32, i32) {
    %c0_i32 = arith.constant 0 : i32
    %c0_i32_0 = arith.constant 0 : i32
    return %arg0, %arg1, %c0_i32 : i32, i32, i32
  }
  func.func @transform_1(%arg0: i32, %arg1: i32) -> (i32, i32, i32) {
    %c0_i32 = arith.constant 0 : i32
    %c0_i32_0 = arith.constant 0 : i32
    %c0_i32_1 = arith.constant 0 : i32
    return %arg0, %c0_i32, %c0_i32_0 : i32, i32, i32
  }
  func.func @transform_2(%arg0: i32, %arg1: i32) -> (i32, i32, i32) {
    %c0_i32 = arith.constant 0 : i32
    %c0_i32_0 = arith.constant 0 : i32
    %c0_i32_1 = arith.constant 0 : i32
    return %arg0, %c0_i32, %c0_i32_0 : i32, i32, i32
  }
  func.func @transform_3(%arg0: i32, %arg1: i32) -> (i32, i32, i32) {
    %c0_i32 = arith.constant 0 : i32
    %c0_i32_0 = arith.constant 0 : i32
    return %arg0, %arg1, %c0_i32 : i32, i32, i32
  }
  func.func @transform_4(%arg0: i32, %arg1: i32) -> (i32, i32, i32) {
    %c0_i32 = arith.constant 0 : i32
    %c0_i32_0 = arith.constant 0 : i32
    return %arg0, %arg1, %c0_i32 : i32, i32, i32
  }
}

</mosaic_0001>

<bundles_post_ra>
// kernel: tpu_custom_call.1
= control target key start
LH: loop header
LB: loop body
LE: loop exit
PB: predicated region body
PF: predicated region fallthrough
CT: control target
= control target key end

     0   :  { %10 = vsyncpa [#allocation3], 0  ;;  %s732_s0 = inlined_call_operand.hbm [shape: f32[2,8,32], index: 0, kind: input, shape index: {}]   ;;  %s733_s1 = inlined_call_operand.hbm [shape: f32[2,8,32], index: 1, kind: input, shape index: {}]   ;;  %s734_s2 = inlined_call_operand.hbm [shape: f32[2,8,32], index: 2, kind: input, shape index: {}]   ;;  %s735_s3 = inlined_call_operand.hbm [shape: f32[2,8,32], index: 3, kind: output, shape index: {0}]   ;;  %s736_s4 = inlined_call_operand.hbm [shape: f32[2,8,8], index: 4, kind: output, shape index: {1}]  }
   0x1   :  { %11 = vsyncpa [#allocation6], 0 }
   0x2   :  { %12 = vsyncpa [#allocation4], 0 }
   0x3   :  { %13 = vsyncpa [#allocation10], 0  ;;  %s598_s15 = smov [#allocation5]   ;;  %s599_s17 = smov [#allocation2]  }
   0x4   :  { %s31_s16 = sshll.u32 %s598_s15, 4  ;;  %s19_s18 = sshll.u32 %s599_s17, 4  ;;  %s32_s16 = int_to_ptr.vmem [resolvable:$true] %s31_s16  ;;  %s632_s18 = int_to_ptr.vmem [resolvable:$true] %s19_s18 }
   0x5   :  { %s480_s21 = scalar_lea.hbm %s733_s1, 256 }
   0x6   :  { %p481_p0 = scmp.ne.s32.totalorder %s733_s1, %s480_s21  ;;  %p484_p1 = scmp.lt.u32.totalorder %s480_s21, %s733_s1 }
   0x8   :  { %p486_p2 = pnand %p484_p1, %p481_p0 }
   0xa   :  { %489 = shalt.err (!%p486_p2)
}
   0xb   :  { %s490_s26 = scalar_lea.vmem %s32_s16, 256  ;;  %p495_p4 = scmp.lt.s32.totalorder %s32_s16, %s32_s16 }
   0xc   :  { %p491_p3 = scmp.ne.s32.totalorder %s32_s16, %s490_s26  ;;  %p496_p5 = scmp.lt.s32.totalorder %s490_s26, %s490_s26 }
   0xe   :  { %p497_p6 = por %p496_p5, %p495_p4 }
  0x10   :  { %p498_p7 = pnand %p497_p6, %p491_p3 }
  0x12   :  { %501 = shalt.err (!%p498_p7)
}
  0x13   :  { %s600_s27 = smov 128   ;;  %s601_s28 = smov 8  }
  0x14   :  { %37 = dma.hbm_to_vmem [thread:$0]  %s733_s1, 256, %s32_s16, [#allocation6], %s600_s27, %s600_s27, %s601_s28  }
  0x15   :  { %s502_s7 = scalar_lea.hbm %s732_s0, 256 }
  0x16   :  { %p503_p8 = scmp.ne.s32.totalorder %s732_s0, %s502_s7  ;;  %p506_p9 = scmp.lt.u32.totalorder %s502_s7, %s732_s0 }
  0x18   :  { %p508_p10 = pnand %p506_p9, %p503_p8 }
  0x1a   :  { %511 = shalt.err (!%p508_p10)
}
  0x1b   :  { %s512_s12 = scalar_lea.vmem %s632_s18, 256  ;;  %p517_p12 = scmp.lt.s32.totalorder %s632_s18, %s632_s18 }
  0x1c   :  { %p513_p11 = scmp.ne.s32.totalorder %s632_s18, %s512_s12  ;;  %p518_p13 = scmp.lt.s32.totalorder %s512_s12, %s512_s12 }
  0x1e   :  { %p519_p0 = por %p518_p13, %p517_p12 }
  0x20   :  { %p520_p1 = pnand %p519_p0, %p513_p11 }
  0x22   :  { %523 = shalt.err (!%p520_p1)
}
  0x23   :  { %25 = dma.hbm_to_vmem [thread:$0]  %s732_s0, 256, %s632_s18, [#allocation3], %s600_s27, %s600_s27, %s601_s28  }
  0x24   :  { %s602_s14 = smov [#allocation7]   ;;  %s524_s19 = scalar_lea.hbm %s734_s2, 256 }
  0x25   :  { %s43_s15 = sshll.u32 %s602_s14, 4  ;;  %p525_p2 = scmp.ne.s32.totalorder %s734_s2, %s524_s19  ;;  %s44_s15 = int_to_ptr.vmem [resolvable:$true] %s43_s15 }
  0x26   :  { %p528_p3 = scmp.lt.u32.totalorder %s524_s19, %s734_s2 }
  0x28   :  { %p530_p4 = pnand %p528_p3, %p525_p2 }
  0x2a   :  { %533 = shalt.err (!%p530_p4)
}
  0x2b   :  { %s534_s24 = scalar_lea.vmem %s44_s15, 256  ;;  %p539_p6 = scmp.lt.s32.totalorder %s44_s15, %s44_s15 }
  0x2c   :  { %p535_p5 = scmp.ne.s32.totalorder %s44_s15, %s534_s24  ;;  %p540_p7 = scmp.lt.s32.totalorder %s534_s24, %s534_s24 }
  0x2e   :  { %p541_p8 = por %p540_p7, %p539_p6 }
  0x30   :  { %p542_p9 = pnand %p541_p8, %p535_p5 }
  0x32   :  { %545 = shalt.err (!%p542_p9)
}
  0x33   :  { %49 = dma.hbm_to_vmem [thread:$0]  %s734_s2, 256, %s44_s15, [#allocation6], %s600_s27, %s600_s27, %s601_s28  }
  0x34   :  { %590 = dma.done.wait [#allocation3], 256  }
  0x35   :  { %591 = vsyncadd [#allocation3], 4294967040 }
  0x36   :  { %592 = dma.done.wait [#allocation6], 512  }
  0x37   :  { %593 = vsyncadd [#allocation6], 4294966784  ;;  %v603_v0 = vmov 0.0   ;;  %vm604_vm0 = vmmov 0   ;;  %vm67_vm1 = vcmask 261120   ;;  %v61_v1 = vld [vmem:[#allocation5] sm:$0xff] }
  0x38   :  { %443 = vmatprep.subr.mxu0 %v603_v0  ;;  %445 = vmatprep.mubr.msk.f32.mxu0 %vm604_vm0, %v603_v0  ;;  %v59_v2 = vld [vmem:[#allocation2] sm:$0xff]  ;;  %v62_v3 = vld [vmem:[#allocation5 + $0x8] sm:$0xff]  ;;  %v60_v5 = vld [vmem:[#allocation2 + $0x8] sm:$0xff]  ;;  %vm220_vm2 = vcmask 64512   ;;  %s605_s2 = smov [#allocation9]  }
  0x39   :  { %448 = vmatprep.subr.mxu1 %v603_v0  ;;  %450 = vmatprep.mubr.msk.f32.mxu1 %vm604_vm0, %v603_v0  ;;  %v65_v4 = vmul.f32 0.17677669, %v59_v2  ;;  %v66_v6 = vmul.f32 0.17677669, %v60_v5  ;;  %v63_v13 = vld [vmem:[#allocation7] sm:$0xff]  ;;  %v64_v14 = vld [vmem:[#allocation7 + $0x8] sm:$0xff] }
  0x3a   :  { %444 = vmatpush3.xpose.msk.msra.mxu0 %vm67_vm1, %v61_v1  ;;  %449 = vmatpush3.xpose.msk.msra.mxu1 %vm67_vm1, %v62_v3  ;;  %s412_s25 = sshll.u32 %s605_s2, 4  ;;  %s413_s25 = int_to_ptr.vmem [resolvable:$true] %s412_s25 }
  0x3b   :  { %453 = vmatprep.subr.mxu0 %v603_v0  ;;  %458 = vmatprep.subr.mxu1 %v603_v0  ;;  %s546_s26 = scalar_lea.vmem %s413_s25, 256  ;;  %p551_p11 = scmp.lt.s32.totalorder %s413_s25, %s413_s25 }
  0x3c   :  { %p547_p10 = scmp.ne.s32.totalorder %s413_s25, %s546_s26  ;;  %p552_p12 = scmp.lt.s32.totalorder %s546_s26, %s546_s26 }
  0x3d   :  { %446 = vmatmul.mubr.msk.f32.vlgmr.msra.gmra.mrb[0].mxu0 %vm67_vm1, %v65_v4  ;;  %451 = vmatmul.mubr.msk.f32.vlgmr.msra.gmra.mrb[0].mxu1 %vm67_vm1, %v66_v6 }
  0x3e   :  { %455 = vmatprep.mubr.msk.f32.mxu0 %vm604_vm0, %v603_v0  ;;  %460 = vmatprep.mubr.msk.f32.mxu1 %vm604_vm0, %v603_v0  ;;  %p553_p13 = por %p552_p12, %p551_p11 }
  0x3f   :  { %454 = vmatpush3.msra.mxu0 %v63_v13  ;;  %459 = vmatpush3.msra.mxu1 %v64_v14 }
  0x40   :  { %p554_p0 = pnand %p553_p13, %p547_p10 }
 0x110   :  { %v140_v7 = vpop.f32.mrb[0].mxu0  ;;  %v216_v8 = vpop.f32.mrb[0].mxu1 }
 0x111   :  { %v447_v9 = vpop.f32.mrb[1].mxu0  ;;  %v221_v10 = vsel %vm220_vm2, %v140_v7, -inf  ;;  %v452_v11 = vpop.f32.mrb[1].mxu1  ;;  %v224_v12 = vsel %vm220_vm2, %v216_v8, -inf }
 0x112   :  { %222 = vmax.xlane.f32.xlu0 %v221_v10 }
 0x116   :  { %225 = vmax.xlane.f32.xlu0 %v224_v12 }
 0x19f   :  { %v223_v15 = vpop.xlane.xlu0 %222 }
 0x1a0   :  { %v227_v16 = vsub.f32 %v140_v7, %v223_v15 }
 0x1a2   :  { %v229_v17 = vmul.f32 1.442695, %v227_v16 }
 0x1a3   :  { %v226_v18 = vpop.xlane.xlu0 %225 }
 0x1a4   :  { %472 = vpow2.f32 %v229_v17  ;;  %v228_v19 = vsub.f32 %v216_v8, %v226_v18 }
 0x1a6   :  { %v231_v20 = vmul.f32 1.442695, %v228_v19 }
 0x1a8   :  { %474 = vpow2.f32 %v231_v20 }
 0x1ae   :  { %v473_v21 = vpop.eup %472 }
 0x1af   :  { %456 = vmatmul.mubr.msk.f32.vlgmr.msra.gmra.mrb[2].mxu0 %vm220_vm2, %v473_v21  ;;  %v233_v22 = vsel %vm220_vm2, %v473_v21, 0.0 }
 0x1b0   :  { %234 = vadd.xlane.f32.xlu1 %v233_v22 }
 0x1b2   :  { %v475_v23 = vpop.eup %474 }
 0x1b3   :  { %461 = vmatmul.mubr.msk.f32.vlgmr.msra.gmra.mrb[2].mxu1 %vm220_vm2, %v475_v23  ;;  %v236_v24 = vsel %vm220_vm2, %v475_v23, 0.0 }
 0x1b4   :  { %237 = vadd.xlane.f32.xlu1 %v236_v24 }
 0x23d   :  { %v235_v25 = vpop.xlane.xlu1 %234 }
 0x23e   :  { %476 = vrcp.f32 %v235_v25 }
 0x241   :  { %v238_v26 = vpop.xlane.xlu1 %237 }
 0x242   :  { %478 = vrcp.f32 %v238_v26 }
 0x248   :  { %v477_v27 = vpop.eup %476 }
 0x249   :  { %v391_v28 = vmul.f32 %v477_v27, %v473_v21 }
 0x24b   :  { %393 = vst.msk [vmem:[#allocation9] sm:$0xff] %vm220_vm2, %v391_v28 }
 0x24c   :  { %v479_v29 = vpop.eup %478 }
 0x24d   :  { %v392_v30 = vmul.f32 %v479_v29, %v475_v23 }
 0x24f   :  { %394 = vst.msk [vmem:[#allocation9 + $0x8] sm:$0xff] %vm220_vm2, %v392_v30 }
 0x250   :  { %557 = shalt.err (!%p554_p0)
}
 0x251   :  { %s558_s5 = scalar_lea.hbm %s736_s4, 256 }
 0x252   :  { %p559_p1 = scmp.ne.s32.totalorder %s736_s4, %s558_s5  ;;  %p562_p2 = scmp.lt.u32.totalorder %s558_s5, %s736_s4 }
 0x254   :  { %p564_p3 = pnand %p562_p2, %p559_p1 }
 0x256   :  { %567 = shalt.err (!%p564_p3)
}
 0x257   :  { %418 = dma.vmem_to_hbm [thread:$0]  %s413_s25, 256, %s736_s4, [#allocation10], %s600_s27, %s600_s27, %s601_s28  }
 0x258   :  { %s606_s12 = smov [#allocation8]  }
 0x259   :  { %s400_s1 = sshll.u32 %s606_s12, 4  ;;  %s401_s1 = int_to_ptr.vmem [resolvable:$true] %s400_s1 }
 0x25a   :  { %s568_s13 = scalar_lea.vmem %s401_s1, 256  ;;  %p573_p5 = scmp.lt.s32.totalorder %s401_s1, %s401_s1 }
 0x25b   :  { %p569_p4 = scmp.ne.s32.totalorder %s401_s1, %s568_s13  ;;  %p574_p6 = scmp.lt.s32.totalorder %s568_s13, %s568_s13 }
 0x25d   :  { %p575_p7 = por %p574_p6, %p573_p5 }
 0x25f   :  { %p576_p8 = pnand %p575_p7, %p569_p4 }
 0x282   :  { %v310_v31 = vpop.f32.mrb[2].mxu0 }
 0x283   :  { %v387_v32 = vmul.f32 %v477_v27, %v310_v31  ;;  %v457_v33 = vpop.f32.mrb[3].mxu0 }
 0x285   :  { %389 = vst.msk [vmem:[#allocation8] sm:$0xff] %vm67_vm1, %v387_v32 }
 0x286   :  { %v383_v34 = vpop.f32.mrb[2].mxu1 }
 0x287   :  { %v388_v35 = vmul.f32 %v479_v29, %v383_v34  ;;  %v462_v36 = vpop.f32.mrb[3].mxu1 }
 0x289   :  { %390 = vst.msk [vmem:[#allocation8 + $0x8] sm:$0xff] %vm67_vm1, %v388_v35 }
 0x28a   :  { %579 = shalt.err (!%p576_p8)
}
 0x28b   :  { %s580_s15 = scalar_lea.hbm %s735_s3, 256 }
 0x28c   :  { %p581_p9 = scmp.ne.s32.totalorder %s735_s3, %s580_s15  ;;  %p584_p10 = scmp.lt.u32.totalorder %s580_s15, %s735_s3 }
 0x28e   :  { %p586_p11 = pnand %p584_p10, %p581_p9 }
 0x290   :  { %589 = shalt.err (!%p586_p11)
}
 0x291   :  { %406 = dma.vmem_to_hbm [thread:$0]  %s401_s1, 256, %s735_s3, [#allocation4], %s600_s27, %s600_s27, %s601_s28  }
 0x292   :  { %594 = dma.done.wait [#allocation4], 256  }
 0x293   :  { %595 = vsyncadd [#allocation4], 4294967040 }
 0x294   :  { %596 = dma.done.wait [#allocation10], 256  }
 0x295   :  { %597 = vsyncadd [#allocation10], 4294967040 }
 0x296   :  { %425 = vsyncpa [#allocation3], 1 }
 0x297   :  { %426 = vsyncpa [#allocation6], 1 }
 0x298   :  { %427 = vsyncpa [#allocation4], 1 }
 0x299   :  { %428 = vsyncpa [#allocation10], 1 }

</bundles_post_ra>
